<compile_context>
chip_gen: v6e
topology: v6e:2x2x1
jax: 0.10.0
libtpu: 0.0.40
codegen_flags: <defaults>
</compile_context>

<pallas_src>
import jax
import jax.numpy as jnp
from jax.experimental import pallas as pl
from jax.experimental.pallas import tpu as pltpu


# --------------------------------------------------------------------------- #
# Kernel                                                                      #
# --------------------------------------------------------------------------- #
def _double_critic_kernel(s_ref, a_ref,
                          w1s_ref, w1a_ref, b1_ref,
                          w21_ref, b21_ref, w22_ref, b22_ref,
                          w31_ref, b31_ref, w32_ref, b32_ref,
                          *out_refs):
    """Fused two-head critic MLP for one batch tile, entirely in VMEM.

    Layer 1:  h  = relu(state @ W1_s + action @ W1_a + b1)     (TB, 2H)
    Layer 2:  g1 = relu(h[:, :H] @ W2_1 + b2_1)                (TB, H)
              g2 = relu(h[:, H:] @ W2_2 + b2_2)                (TB, H)
    Layer 3:  q1 = g1 @ W3_1 + b3_1 ; q2 = g2 @ W3_2 + b3_2    (TB, 1) each
    Output:   (q1, q2) refs, or a single min(q1, q2) ref.
    """
    cdt = w1s_ref.dtype                       # compute dtype (bf16 by default)
    H = w21_ref.shape[0]

    # Layer 1 — activations cast in-kernel, f32 accumulation, f32 bias/ReLU.
    h = (jnp.dot(s_ref[...].astype(cdt), w1s_ref[...],
                 preferred_element_type=jnp.float32)
         + jnp.dot(a_ref[...].astype(cdt), w1a_ref[...],
                   preferred_element_type=jnp.float32)
         + b1_ref[...])
    h = jnp.maximum(h, 0.0).astype(cdt)

    # Layer 2 — two dense (H, H) dots on the lane halves (no block-diag zeros).
    h1 = h[:, :H]
    h2 = h[:, H:]
    g1 = jnp.maximum(
        jnp.dot(h1, w21_ref[...], preferred_element_type=jnp.float32)
        + b21_ref[...], 0.0).astype(cdt)
    g2 = jnp.maximum(
        jnp.dot(h2, w22_ref[...], preferred_element_type=jnp.float32)
        + b22_ref[...], 0.0).astype(cdt)

    # Layer 3 — per-head (H, 1) dots.
    q1 = jnp.dot(g1, w31_ref[...], preferred_element_type=jnp.float32) + b31_ref[...]
    q2 = jnp.dot(g2, w32_ref[...], preferred_element_type=jnp.float32) + b32_ref[...]

    if len(out_refs) == 1:                    # fused DoubleCritic.q(): min head
        out_refs[0][...] = jnp.minimum(q1, q2).astype(out_refs[0].dtype)
    else:                                     # DoubleCritic.forward(): (q1, q2)
        out_refs[0][...] = q1.astype(out_refs[0].dtype)
        out_refs[1][...] = q2.astype(out_refs[1].dtype)


# --------------------------------------------------------------------------- #
# One-time parameter fusion (hoist out of the per-forward path)               #
# --------------------------------------------------------------------------- #
def _round_up(x, m):
    return ((x + m - 1) // m) * m


def fuse_double_critic_params(params, state_dim, compute_dtype=jnp.bfloat16):
    """Fuse/cast per-head parameters ONCE (call per parameter update, not per
    forward). Layer-1 weights of both heads are concatenated along the output
    axis and split into state/action rows; layers 2/3 stay per-head dense."""
    # TODO(synk): for v5e MXU efficiency, choose hidden_dim as a multiple of
    #             128 at model-definition time (no padding is done here).
    p1, p2 = params["q1"], params["q2"]
    cdt = jnp.dtype(compute_dtype)
    cast = lambda w: w.astype(cdt)

    w1 = jnp.concatenate([p1["w1"], p2["w1"]], axis=1)           # (in_dim, 2H)
    fused = {
        "w1s": cast(w1[:state_dim]),                             # (state_dim, 2H)
        "w1a": cast(w1[state_dim:]),                             # (action_dim, 2H)
        "b1": jnp.concatenate([p1["b1"], p2["b1"]], axis=1).astype(jnp.float32),
        "w2_1": cast(p1["w2"]), "b2_1": p1["b2"].astype(jnp.float32),
        "w2_2": cast(p2["w2"]), "b2_2": p2["b2"].astype(jnp.float32),
        "w3_1": cast(p1["w3"]), "b3_1": p1["b3"].astype(jnp.float32),
        "w3_2": cast(p2["w3"]), "b3_2": p2["b3"].astype(jnp.float32),
        "hidden_dim": int(p1["w2"].shape[0]),
        "state_dim": int(state_dim),
        "compute_dtype": cdt,
    }
    return fused


# --------------------------------------------------------------------------- #
# Wrapper: tiling + pallas_call                                               #
# --------------------------------------------------------------------------- #
# Whether this JAX version accepts pl.Buffered(1) on a top-level BlockSpec
# (single-buffered, grid-invariant weights).  Probed once, then cached.
_SINGLE_BUFFER_WEIGHTS_OK = None


def _run_double_critic(state, action, fused, *, reduce_min, batch_tile=512):
    global _SINGLE_BUFFER_WEIGHTS_OK

    B, state_dim = state.shape
    action_dim = action.shape[1]
    assert state_dim == fused["state_dim"], "state_dim mismatch with fused params"
    H = fused["hidden_dim"]
    cdt = fused["compute_dtype"]
    n_out = 1 if reduce_min else 2

    # --- batch tile selection -------------------------------------------- #
    # bf16 packs two rows per sublane -> tile rows in multiples of 16.
    row_align = 8 if cdt.itemsize == 4 else 16
    cap = max(row_align, _round_up(batch_tile, row_align))
    if B >= 256:
        # >= 2 grid steps so the "parallel" axis can shard across v7x's 2 TCs.
        TB = _round_up(pl.cdiv(B, 2), row_align)
    else:
        TB = _round_up(B, row_align)
    TB = min(TB, cap)
    grid = (pl.cdiv(B, TB),)          # last block may be partial (no jnp.pad)

    weight_arrays = [fused["w1s"], fused["w1a"], fused["b1"],
                     fused["w2_1"], fused["b2_1"], fused["w2_2"], fused["b2_2"],
                     fused["w3_1"], fused["b3_1"], fused["w3_2"], fused["b3_2"]]

    # --- VMEM budget (only raise the scoped limit when actually needed) --- #
    w_bytes = sum(int(a.size) * a.dtype.itemsize for a in weight_arrays)
    act_tiles = 2 * TB * (state_dim + action_dim) * state.dtype.itemsize
    out_tiles = 2 * TB * n_out * 4
    interm = 6 * TB * 2 * H * 4       # h/g activations + f32 accumulators
    est = 2 * w_bytes + act_tiles + out_tiles + interm
    vmem_limit = None
    if est > 12 * 1024 * 1024:        # above the smallest (v5e) scoped default
        vmem_limit = min(int(est * 1.5), 64 * 1024 * 1024)   # valid on v7x too

    # --- specs ------------------------------------------------------------ #
    def _in_specs(single_buffer_weights):
        def wspec(arr):
            if single_buffer_weights:
                return pl.BlockSpec(arr.shape, lambda i: (0, 0),
                                    pipeline_mode=pl.Buffered(1))
            return pl.BlockSpec(arr.shape, lambda i: (0, 0))
        specs = [pl.BlockSpec((TB, state_dim), lambda i: (i, 0)),
                 pl.BlockSpec((TB, action_dim), lambda i: (i, 0))]
        specs += [wspec(a) for a in weight_arrays]
        return specs

    out_block = pl.BlockSpec((TB, 1), lambda i: (i, 0))
    if reduce_min:
        out_shape = jax.ShapeDtypeStruct((B, 1), jnp.float32)
        out_specs = out_block
    else:
        out_shape = (jax.ShapeDtypeStruct((B, 1), jnp.float32),
                     jax.ShapeDtypeStruct((B, 1), jnp.float32))
        out_specs = (out_block, out_block)

    def _call(single_buffer_weights):
        return pl.pallas_call(
            _double_critic_kernel,
            out_shape=out_shape,
            grid=grid,
            in_specs=_in_specs(single_buffer_weights),
            out_specs=out_specs,
            compiler_params=pltpu.CompilerParams(
                dimension_semantics=("parallel",),
                vmem_limit_bytes=vmem_limit),
        )(state, action, *weight_arrays)

    if _SINGLE_BUFFER_WEIGHTS_OK is None:
        try:
            out = jax.block_until_ready(_call(True))
            _SINGLE_BUFFER_WEIGHTS_OK = True
            return out
        except Exception:
            _SINGLE_BUFFER_WEIGHTS_OK = False
            return _call(False)
    return _call(_SINGLE_BUFFER_WEIGHTS_OK)


def double_critic_forward(state, action, fused_params):
    """DoubleCritic.forward: returns (q1, q2), each (B, 1) f32."""
    return _run_double_critic(state, action, fused_params, reduce_min=False)


def double_critic_q(state, action, fused_params):
    """DoubleCritic.q: element-wise min of the two heads (fused in-kernel)."""
    return _run_double_critic(state, action, fused_params, reduce_min=True)


# --------------------------------------------------------------------------- #
# Parameters + pure-JAX reference                                             #
# --------------------------------------------------------------------------- #
def init_params(key, in_dim, hidden_dim):
    """Deterministic synthetic parameters matching the PyTorch module's shapes."""
    def mlp_params(k):
        k1, k2, k3 = jax.random.split(k, 3)
        return {
            "w1": jax.random.normal(k1, (in_dim, hidden_dim), jnp.float32) * 0.1,
            "b1": jnp.full((1, hidden_dim), 0.01, jnp.float32),
            "w2": jax.random.normal(k2, (hidden_dim, hidden_dim), jnp.float32) * 0.1,
            "b2": jnp.full((1, hidden_dim), 0.01, jnp.float32),
            "w3": jax.random.normal(k3, (hidden_dim, 1), jnp.float32) * 0.1,
            "b3": jnp.full((1, 1), 0.01, jnp.float32),
        }
    ka, kb = jax.random.split(key)
    return {"q1": mlp_params(ka), "q2": mlp_params(kb)}


def _reference_forward(state, action, params):
    sa = jnp.concatenate([state, action], axis=-1)

    def mlp(p):
        h = jnp.maximum(sa @ p["w1"] + p["b1"], 0.0)
        h = jnp.maximum(h @ p["w2"] + p["b2"], 0.0)
        return h @ p["w3"] + p["b3"]

    return mlp(params["q1"]), mlp(params["q2"])


# --------------------------------------------------------------------------- #
# Demo / correctness check                                                    #
# --------------------------------------------------------------------------- #
if __name__ == "__main__":
    key = jax.random.PRNGKey(0)
    k_s, k_a, k_p = jax.random.split(key, 3)

    batch = 8
    state_dim = 16
    action_dim = 8
    hidden_dim = 32
    in_dim = state_dim + action_dim

    state = jax.random.normal(k_s, (batch, state_dim), jnp.float32)
    action = jax.random.normal(k_a, (batch, action_dim), jnp.float32)
    params = init_params(k_p, in_dim, hidden_dim)

    r1, r2 = _reference_forward(state, action, params)
    r_min = jnp.minimum(r1, r2)

    # f32 path: exact (tight tolerance) check of the fused-head kernel semantics.
    fused_f32 = fuse_double_critic_params(params, state_dim,
                                          compute_dtype=jnp.float32)
    q1, q2 = jax.block_until_ready(double_critic_forward(state, action, fused_f32))
    qmin = jax.block_until_ready(double_critic_q(state, action, fused_f32))
    assert q1.shape == (batch, 1) and q2.shape == (batch, 1) and qmin.shape == (batch, 1)
    assert jnp.allclose(q1, r1, atol=1e-5), "q1 mismatch (f32)"
    assert jnp.allclose(q2, r2, atol=1e-5), "q2 mismatch (f32)"
    assert jnp.allclose(qmin, r_min, atol=1e-5), "q-min mismatch (f32)"

    # bf16 MXU path (default / production): fused once, reused across calls,
    # activation cast happens in-kernel; exercises the partial-last-block path
    # (TB=16 > B=8).  Loose tolerance vs f32 reference.
    fused_bf16 = fuse_double_critic_params(params, state_dim)    # bf16 default
    q1b, q2b = jax.block_until_ready(
        double_critic_forward(state, action, fused_bf16))
    qminb = jax.block_until_ready(double_critic_q(state, action, fused_bf16))
    assert jnp.allclose(q1b, r1, atol=3e-2), "q1 mismatch (bf16)"
    assert jnp.allclose(q2b, r2, atol=3e-2), "q2 mismatch (bf16)"
    assert jnp.allclose(qminb, r_min, atol=3e-2), "q-min mismatch (bf16)"

    print("KERNEL_OK")
</pallas_src>

<mosaic_0001>
module attributes {stable_mosaic.version = 11 : i64} {
  func.func @_double_critic_kernel(%arg0: i32, %arg1: memref<8x16xf32, #tpu.memory_space<vmem>>, %arg2: memref<8x8xf32, #tpu.memory_space<vmem>>, %arg3: memref<16x64xf32, #tpu.memory_space<vmem>>, %arg4: memref<8x64xf32, #tpu.memory_space<vmem>>, %arg5: memref<1x64xf32, #tpu.memory_space<vmem>>, %arg6: memref<32x32xf32, #tpu.memory_space<vmem>>, %arg7: memref<1x32xf32, #tpu.memory_space<vmem>>, %arg8: memref<32x32xf32, #tpu.memory_space<vmem>>, %arg9: memref<1x32xf32, #tpu.memory_space<vmem>>, %arg10: memref<32x1xf32, #tpu.memory_space<vmem>>, %arg11: memref<1x1xf32, #tpu.memory_space<vmem>>, %arg12: memref<32x1xf32, #tpu.memory_space<vmem>>, %arg13: memref<1x1xf32, #tpu.memory_space<vmem>>, %arg14: memref<8x1xf32, #tpu.memory_space<vmem>>, %arg15: memref<8x1xf32, #tpu.memory_space<vmem>>) attributes {dimension_semantics = [#tpu.dimension_semantics<parallel>], iteration_bounds = array<i64: 1>, scalar_prefetch = 0 : i64, scratch_operands = 0 : i64, tpu.core_type = #tpu.core_type<tc>, window_params = [{transform_indices = @transform_0, window_bounds = array<i64: 8, 16>}, {transform_indices = @transform_1, window_bounds = array<i64: 8, 8>}, {pipeline_mode = #tpu.pipeline_mode<synchronous>, transform_indices = @transform_2, window_bounds = array<i64: 16, 64>}, {pipeline_mode = #tpu.pipeline_mode<synchronous>, transform_indices = @transform_3, window_bounds = array<i64: 8, 64>}, {pipeline_mode = #tpu.pipeline_mode<synchronous>, transform_indices = @transform_4, window_bounds = array<i64: 1, 64>}, {pipeline_mode = #tpu.pipeline_mode<synchronous>, transform_indices = @transform_5, window_bounds = array<i64: 32, 32>}, {pipeline_mode = #tpu.pipeline_mode<synchronous>, transform_indices = @transform_6, window_bounds = array<i64: 1, 32>}, {pipeline_mode = #tpu.pipeline_mode<synchronous>, transform_indices = @transform_7, window_bounds = array<i64: 32, 32>}, {pipeline_mode = #tpu.pipeline_mode<synchronous>, transform_indices = @transform_8, window_bounds = array<i64: 1, 32>}, {pipeline_mode = #tpu.pipeline_mode<synchronous>, transform_indices = @transform_9, window_bounds = array<i64: 32, 1>}, {pipeline_mode = #tpu.pipeline_mode<synchronous>, transform_indices = @transform_10, window_bounds = array<i64: 1, 1>}, {pipeline_mode = #tpu.pipeline_mode<synchronous>, transform_indices = @transform_11, window_bounds = array<i64: 32, 1>}, {pipeline_mode = #tpu.pipeline_mode<synchronous>, transform_indices = @transform_12, window_bounds = array<i64: 1, 1>}, {transform_indices = @transform_13, window_bounds = array<i64: 8, 1>}, {transform_indices = @transform_14, window_bounds = array<i64: 8, 1>}]} {
    %c0 = arith.constant 0 : index
    %c0_0 = arith.constant 0 : index
    %0 = vector.load %arg1[%c0, %c0_0] : memref<8x16xf32, #tpu.memory_space<vmem>>, vector<8x16xf32>
    %c0_1 = arith.constant 0 : index
    %c0_2 = arith.constant 0 : index
    %1 = vector.load %arg3[%c0_1, %c0_2] : memref<16x64xf32, #tpu.memory_space<vmem>>, vector<16x64xf32>
    %cst = arith.constant dense<0.000000e+00> : vector<8x64xf32>
    %2 = tpu.matmul %0, %1, %cst {dimension_numbers = #tpu.dot_dimension_numbers<[1], [0], [0], [1], [0, 0, 1, 1], [], []>} : vector<8x16xf32>, vector<16x64xf32>, vector<8x64xf32> -> vector<8x64xf32>
    %c0_3 = arith.constant 0 : index
    %c0_4 = arith.constant 0 : index
    %3 = vector.load %arg2[%c0_3, %c0_4] : memref<8x8xf32, #tpu.memory_space<vmem>>, vector<8x8xf32>
    %c0_5 = arith.constant 0 : index
    %c0_6 = arith.constant 0 : index
    %4 = vector.load %arg4[%c0_5, %c0_6] : memref<8x64xf32, #tpu.memory_space<vmem>>, vector<8x64xf32>
    %cst_7 = arith.constant dense<0.000000e+00> : vector<8x64xf32>
    %5 = tpu.matmul %3, %4, %cst_7 {dimension_numbers = #tpu.dot_dimension_numbers<[1], [0], [0], [1], [0, 0, 1, 1], [], []>} : vector<8x8xf32>, vector<8x64xf32>, vector<8x64xf32> -> vector<8x64xf32>
    %6 = arith.addf %2, %5 : vector<8x64xf32>
    %c0_8 = arith.constant 0 : index
    %c0_9 = arith.constant 0 : index
    %7 = vector.load %arg5[%c0_8, %c0_9] : memref<1x64xf32, #tpu.memory_space<vmem>>, vector<1x64xf32>
    %8 = vector.broadcast %7 : vector<1x64xf32> to vector<8x64xf32>
    %9 = arith.addf %6, %8 : vector<8x64xf32>
    %cst_10 = arith.constant 0.000000e+00 : f32
    %10 = vector.broadcast %cst_10 : f32 to vector<8x64xf32>
    %11 = arith.maximumf %9, %10 : vector<8x64xf32>
    %12 = vector.extract_strided_slice %11 {offsets = [0, 0], sizes = [8, 32], strides = [1, 1]} : vector<8x64xf32> to vector<8x32xf32>
    %13 = vector.extract_strided_slice %11 {offsets = [0, 32], sizes = [8, 32], strides = [1, 1]} : vector<8x64xf32> to vector<8x32xf32>
    %c0_11 = arith.constant 0 : index
    %c0_12 = arith.constant 0 : index
    %14 = vector.load %arg6[%c0_11, %c0_12] : memref<32x32xf32, #tpu.memory_space<vmem>>, vector<32x32xf32>
    %cst_13 = arith.constant dense<0.000000e+00> : vector<8x32xf32>
    %15 = tpu.matmul %12, %14, %cst_13 {dimension_numbers = #tpu.dot_dimension_numbers<[1], [0], [0], [1], [0, 0, 1, 1], [], []>} : vector<8x32xf32>, vector<32x32xf32>, vector<8x32xf32> -> vector<8x32xf32>
    %c0_14 = arith.constant 0 : index
    %c0_15 = arith.constant 0 : index
    %16 = vector.load %arg7[%c0_14, %c0_15] : memref<1x32xf32, #tpu.memory_space<vmem>>, vector<1x32xf32>
    %17 = vector.broadcast %16 : vector<1x32xf32> to vector<8x32xf32>
    %18 = arith.addf %15, %17 : vector<8x32xf32>
    %cst_16 = arith.constant 0.000000e+00 : f32
    %19 = vector.broadcast %cst_16 : f32 to vector<8x32xf32>
    %20 = arith.maximumf %18, %19 : vector<8x32xf32>
    %c0_17 = arith.constant 0 : index
    %c0_18 = arith.constant 0 : index
    %21 = vector.load %arg8[%c0_17, %c0_18] : memref<32x32xf32, #tpu.memory_space<vmem>>, vector<32x32xf32>
    %cst_19 = arith.constant dense<0.000000e+00> : vector<8x32xf32>
    %22 = tpu.matmul %13, %21, %cst_19 {dimension_numbers = #tpu.dot_dimension_numbers<[1], [0], [0], [1], [0, 0, 1, 1], [], []>} : vector<8x32xf32>, vector<32x32xf32>, vector<8x32xf32> -> vector<8x32xf32>
    %c0_20 = arith.constant 0 : index
    %c0_21 = arith.constant 0 : index
    %23 = vector.load %arg9[%c0_20, %c0_21] : memref<1x32xf32, #tpu.memory_space<vmem>>, vector<1x32xf32>
    %24 = vector.broadcast %23 : vector<1x32xf32> to vector<8x32xf32>
    %25 = arith.addf %22, %24 : vector<8x32xf32>
    %cst_22 = arith.constant 0.000000e+00 : f32
    %26 = vector.broadcast %cst_22 : f32 to vector<8x32xf32>
    %27 = arith.maximumf %25, %26 : vector<8x32xf32>
    %c0_23 = arith.constant 0 : index
    %c0_24 = arith.constant 0 : index
    %28 = vector.load %arg10[%c0_23, %c0_24] : memref<32x1xf32, #tpu.memory_space<vmem>>, vector<32x1xf32>
    %cst_25 = arith.constant dense<0.000000e+00> : vector<8x1xf32>
    %29 = tpu.matmul %20, %28, %cst_25 {dimension_numbers = #tpu.dot_dimension_numbers<[1], [0], [0], [1], [0, 0, 1, 1], [], []>} : vector<8x32xf32>, vector<32x1xf32>, vector<8x1xf32> -> vector<8x1xf32>
    %c0_26 = arith.constant 0 : index
    %c0_27 = arith.constant 0 : index
    %30 = vector.load %arg11[%c0_26, %c0_27] : memref<1x1xf32, #tpu.memory_space<vmem>>, vector<1x1xf32>
    %31 = vector.broadcast %30 : vector<1x1xf32> to vector<8x1xf32>
    %32 = arith.addf %29, %31 : vector<8x1xf32>
    %c0_28 = arith.constant 0 : index
    %c0_29 = arith.constant 0 : index
    %33 = vector.load %arg12[%c0_28, %c0_29] : memref<32x1xf32, #tpu.memory_space<vmem>>, vector<32x1xf32>
    %cst_30 = arith.constant dense<0.000000e+00> : vector<8x1xf32>
    %34 = tpu.matmul %27, %33, %cst_30 {dimension_numbers = #tpu.dot_dimension_numbers<[1], [0], [0], [1], [0, 0, 1, 1], [], []>} : vector<8x32xf32>, vector<32x1xf32>, vector<8x1xf32> -> vector<8x1xf32>
    %c0_31 = arith.constant 0 : index
    %c0_32 = arith.constant 0 : index
    %35 = vector.load %arg13[%c0_31, %c0_32] : memref<1x1xf32, #tpu.memory_space<vmem>>, vector<1x1xf32>
    %36 = vector.broadcast %35 : vector<1x1xf32> to vector<8x1xf32>
    %37 = arith.addf %34, %36 : vector<8x1xf32>
    %c0_33 = arith.constant 0 : index
    %c0_34 = arith.constant 0 : index
    %38 = vector.load %arg14[%c0_33, %c0_34] : memref<8x1xf32, #tpu.memory_space<vmem>>, vector<8x1xf32>
    tpu.vector_store %arg14[%c0_33, %c0_34], %32 {strides = array<i32>} : memref<8x1xf32, #tpu.memory_space<vmem>>, vector<8x1xf32>,
    %c0_35 = arith.constant 0 : index
    %c0_36 = arith.constant 0 : index
    %39 = vector.load %arg15[%c0_35, %c0_36] : memref<8x1xf32, #tpu.memory_space<vmem>>, vector<8x1xf32>
    tpu.vector_store %arg15[%c0_35, %c0_36], %37 {strides = array<i32>} : memref<8x1xf32, #tpu.memory_space<vmem>>, vector<8x1xf32>,
    return
  }
  func.func @transform_0(%arg0: i32) -> (i32, i32) {
    %c0_i32 = arith.constant 0 : i32
    %c0_i32_0 = arith.constant 0 : i32
    return %arg0, %c0_i32 : i32, i32
  }
  func.func @transform_1(%arg0: i32) -> (i32, i32) {
    %c0_i32 = arith.constant 0 : i32
    %c0_i32_0 = arith.constant 0 : i32
    return %arg0, %c0_i32 : i32, i32
  }
  func.func @transform_2(%arg0: i32) -> (i32, i32) {
    %c0_i32 = arith.constant 0 : i32
    %c0_i32_0 = arith.constant 0 : i32
    %c0_i32_1 = arith.constant 0 : i32
    return %c0_i32, %c0_i32_0 : i32, i32
  }
  func.func @transform_3(%arg0: i32) -> (i32, i32) {
    %c0_i32 = arith.constant 0 : i32
    %c0_i32_0 = arith.constant 0 : i32
    %c0_i32_1 = arith.constant 0 : i32
    return %c0_i32, %c0_i32_0 : i32, i32
  }
  func.func @transform_4(%arg0: i32) -> (i32, i32) {
    %c0_i32 = arith.constant 0 : i32
    %c0_i32_0 = arith.constant 0 : i32
    %c0_i32_1 = arith.constant 0 : i32
    return %c0_i32, %c0_i32_0 : i32, i32
  }
  func.func @transform_5(%arg0: i32) -> (i32, i32) {
    %c0_i32 = arith.constant 0 : i32
    %c0_i32_0 = arith.constant 0 : i32
    %c0_i32_1 = arith.constant 0 : i32
    return %c0_i32, %c0_i32_0 : i32, i32
  }
  func.func @transform_6(%arg0: i32) -> (i32, i32) {
    %c0_i32 = arith.constant 0 : i32
    %c0_i32_0 = arith.constant 0 : i32
    %c0_i32_1 = arith.constant 0 : i32
    return %c0_i32, %c0_i32_0 : i32, i32
  }
  func.func @transform_7(%arg0: i32) -> (i32, i32) {
    %c0_i32 = arith.constant 0 : i32
    %c0_i32_0 = arith.constant 0 : i32
    %c0_i32_1 = arith.constant 0 : i32
    return %c0_i32, %c0_i32_0 : i32, i32
  }
  func.func @transform_8(%arg0: i32) -> (i32, i32) {
    %c0_i32 = arith.constant 0 : i32
    %c0_i32_0 = arith.constant 0 : i32
    %c0_i32_1 = arith.constant 0 : i32
    return %c0_i32, %c0_i32_0 : i32, i32
  }
  func.func @transform_9(%arg0: i32) -> (i32, i32) {
    %c0_i32 = arith.constant 0 : i32
    %c0_i32_0 = arith.constant 0 : i32
    %c0_i32_1 = arith.constant 0 : i32
    return %c0_i32, %c0_i32_0 : i32, i32
  }
  func.func @transform_10(%arg0: i32) -> (i32, i32) {
    %c0_i32 = arith.constant 0 : i32
    %c0_i32_0 = arith.constant 0 : i32
    %c0_i32_1 = arith.constant 0 : i32
    return %c0_i32, %c0_i32_0 : i32, i32
  }
  func.func @transform_11(%arg0: i32) -> (i32, i32) {
    %c0_i32 = arith.constant 0 : i32
    %c0_i32_0 = arith.constant 0 : i32
    %c0_i32_1 = arith.constant 0 : i32
    return %c0_i32, %c0_i32_0 : i32, i32
  }
  func.func @transform_12(%arg0: i32) -> (i32, i32) {
    %c0_i32 = arith.constant 0 : i32
    %c0_i32_0 = arith.constant 0 : i32
    %c0_i32_1 = arith.constant 0 : i32
    return %c0_i32, %c0_i32_0 : i32, i32
  }
  func.func @transform_13(%arg0: i32) -> (i32, i32) {
    %c0_i32 = arith.constant 0 : i32
    %c0_i32_0 = arith.constant 0 : i32
    return %arg0, %c0_i32 : i32, i32
  }
  func.func @transform_14(%arg0: i32) -> (i32, i32) {
    %c0_i32 = arith.constant 0 : i32
    %c0_i32_0 = arith.constant 0 : i32
    return %arg0, %c0_i32 : i32, i32
  }
}

module attributes {stable_mosaic.version = 11 : i64} {
  func.func @_double_critic_kernel(%arg0: i32, %arg1: memref<8x16xf32, #tpu.memory_space<vmem>>, %arg2: memref<8x8xf32, #tpu.memory_space<vmem>>, %arg3: memref<16x64xf32, #tpu.memory_space<vmem>>, %arg4: memref<8x64xf32, #tpu.memory_space<vmem>>, %arg5: memref<1x64xf32, #tpu.memory_space<vmem>>, %arg6: memref<32x32xf32, #tpu.memory_space<vmem>>, %arg7: memref<1x32xf32, #tpu.memory_space<vmem>>, %arg8: memref<32x32xf32, #tpu.memory_space<vmem>>, %arg9: memref<1x32xf32, #tpu.memory_space<vmem>>, %arg10: memref<32x1xf32, #tpu.memory_space<vmem>>, %arg11: memref<1x1xf32, #tpu.memory_space<vmem>>, %arg12: memref<32x1xf32, #tpu.memory_space<vmem>>, %arg13: memref<1x1xf32, #tpu.memory_space<vmem>>, %arg14: memref<8x1xf32, #tpu.memory_space<vmem>>, %arg15: memref<8x1xf32, #tpu.memory_space<vmem>>) attributes {dimension_semantics = [#tpu.dimension_semantics<parallel>], iteration_bounds = array<i64: 1>, scalar_prefetch = 0 : i64, scratch_operands = 0 : i64, tpu.core_type = #tpu.core_type<tc>, window_params = [{transform_indices = @transform_0, window_bounds = array<i64: 8, 16>}, {transform_indices = @transform_1, window_bounds = array<i64: 8, 8>}, {pipeline_mode = #tpu.pipeline_mode<synchronous>, transform_indices = @transform_2, window_bounds = array<i64: 16, 64>}, {pipeline_mode = #tpu.pipeline_mode<synchronous>, transform_indices = @transform_3, window_bounds = array<i64: 8, 64>}, {pipeline_mode = #tpu.pipeline_mode<synchronous>, transform_indices = @transform_4, window_bounds = array<i64: 1, 64>}, {pipeline_mode = #tpu.pipeline_mode<synchronous>, transform_indices = @transform_5, window_bounds = array<i64: 32, 32>}, {pipeline_mode = #tpu.pipeline_mode<synchronous>, transform_indices = @transform_6, window_bounds = array<i64: 1, 32>}, {pipeline_mode = #tpu.pipeline_mode<synchronous>, transform_indices = @transform_7, window_bounds = array<i64: 32, 32>}, {pipeline_mode = #tpu.pipeline_mode<synchronous>, transform_indices = @transform_8, window_bounds = array<i64: 1, 32>}, {pipeline_mode = #tpu.pipeline_mode<synchronous>, transform_indices = @transform_9, window_bounds = array<i64: 32, 1>}, {pipeline_mode = #tpu.pipeline_mode<synchronous>, transform_indices = @transform_10, window_bounds = array<i64: 1, 1>}, {pipeline_mode = #tpu.pipeline_mode<synchronous>, transform_indices = @transform_11, window_bounds = array<i64: 32, 1>}, {pipeline_mode = #tpu.pipeline_mode<synchronous>, transform_indices = @transform_12, window_bounds = array<i64: 1, 1>}, {transform_indices = @transform_13, window_bounds = array<i64: 8, 1>}, {transform_indices = @transform_14, window_bounds = array<i64: 8, 1>}]} {
    %c0 = arith.constant 0 : index
    %c0_0 = arith.constant 0 : index
    %0 = vector.load %arg1[%c0, %c0_0] : memref<8x16xf32, #tpu.memory_space<vmem>>, vector<8x16xf32>
    %c0_1 = arith.constant 0 : index
    %c0_2 = arith.constant 0 : index
    %1 = vector.load %arg3[%c0_1, %c0_2] : memref<16x64xf32, #tpu.memory_space<vmem>>, vector<16x64xf32>
    %cst = arith.constant dense<0.000000e+00> : vector<8x64xf32>
    %2 = tpu.matmul %0, %1, %cst {dimension_numbers = #tpu.dot_dimension_numbers<[1], [0], [0], [1], [0, 0, 1, 1], [], []>} : vector<8x16xf32>, vector<16x64xf32>, vector<8x64xf32> -> vector<8x64xf32>
    %c0_3 = arith.constant 0 : index
    %c0_4 = arith.constant 0 : index
    %3 = vector.load %arg2[%c0_3, %c0_4] : memref<8x8xf32, #tpu.memory_space<vmem>>, vector<8x8xf32>
    %c0_5 = arith.constant 0 : index
    %c0_6 = arith.constant 0 : index
    %4 = vector.load %arg4[%c0_5, %c0_6] : memref<8x64xf32, #tpu.memory_space<vmem>>, vector<8x64xf32>
    %cst_7 = arith.constant dense<0.000000e+00> : vector<8x64xf32>
    %5 = tpu.matmul %3, %4, %cst_7 {dimension_numbers = #tpu.dot_dimension_numbers<[1], [0], [0], [1], [0, 0, 1, 1], [], []>} : vector<8x8xf32>, vector<8x64xf32>, vector<8x64xf32> -> vector<8x64xf32>
    %6 = arith.addf %2, %5 : vector<8x64xf32>
    %c0_8 = arith.constant 0 : index
    %c0_9 = arith.constant 0 : index
    %7 = vector.load %arg5[%c0_8, %c0_9] : memref<1x64xf32, #tpu.memory_space<vmem>>, vector<1x64xf32>
    %8 = vector.broadcast %7 : vector<1x64xf32> to vector<8x64xf32>
    %9 = arith.addf %6, %8 : vector<8x64xf32>
    %cst_10 = arith.constant 0.000000e+00 : f32
    %10 = vector.broadcast %cst_10 : f32 to vector<8x64xf32>
    %11 = arith.maximumf %9, %10 : vector<8x64xf32>
    %12 = vector.extract_strided_slice %11 {offsets = [0, 0], sizes = [8, 32], strides = [1, 1]} : vector<8x64xf32> to vector<8x32xf32>
    %13 = vector.extract_strided_slice %11 {offsets = [0, 32], sizes = [8, 32], strides = [1, 1]} : vector<8x64xf32> to vector<8x32xf32>
    %c0_11 = arith.constant 0 : index
    %c0_12 = arith.constant 0 : index
    %14 = vector.load %arg6[%c0_11, %c0_12] : memref<32x32xf32, #tpu.memory_space<vmem>>, vector<32x32xf32>
    %cst_13 = arith.constant dense<0.000000e+00> : vector<8x32xf32>
    %15 = tpu.matmul %12, %14, %cst_13 {dimension_numbers = #tpu.dot_dimension_numbers<[1], [0], [0], [1], [0, 0, 1, 1], [], []>} : vector<8x32xf32>, vector<32x32xf32>, vector<8x32xf32> -> vector<8x32xf32>
    %c0_14 = arith.constant 0 : index
    %c0_15 = arith.constant 0 : index
    %16 = vector.load %arg7[%c0_14, %c0_15] : memref<1x32xf32, #tpu.memory_space<vmem>>, vector<1x32xf32>
    %17 = vector.broadcast %16 : vector<1x32xf32> to vector<8x32xf32>
    %18 = arith.addf %15, %17 : vector<8x32xf32>
    %cst_16 = arith.constant 0.000000e+00 : f32
    %19 = vector.broadcast %cst_16 : f32 to vector<8x32xf32>
    %20 = arith.maximumf %18, %19 : vector<8x32xf32>
    %c0_17 = arith.constant 0 : index
    %c0_18 = arith.constant 0 : index
    %21 = vector.load %arg8[%c0_17, %c0_18] : memref<32x32xf32, #tpu.memory_space<vmem>>, vector<32x32xf32>
    %cst_19 = arith.constant dense<0.000000e+00> : vector<8x32xf32>
    %22 = tpu.matmul %13, %21, %cst_19 {dimension_numbers = #tpu.dot_dimension_numbers<[1], [0], [0], [1], [0, 0, 1, 1], [], []>} : vector<8x32xf32>, vector<32x32xf32>, vector<8x32xf32> -> vector<8x32xf32>
    %c0_20 = arith.constant 0 : index
    %c0_21 = arith.constant 0 : index
    %23 = vector.load %arg9[%c0_20, %c0_21] : memref<1x32xf32, #tpu.memory_space<vmem>>, vector<1x32xf32>
    %24 = vector.broadcast %23 : vector<1x32xf32> to vector<8x32xf32>
    %25 = arith.addf %22, %24 : vector<8x32xf32>
    %cst_22 = arith.constant 0.000000e+00 : f32
    %26 = vector.broadcast %cst_22 : f32 to vector<8x32xf32>
    %27 = arith.maximumf %25, %26 : vector<8x32xf32>
    %c0_23 = arith.constant 0 : index
    %c0_24 = arith.constant 0 : index
    %28 = vector.load %arg10[%c0_23, %c0_24] : memref<32x1xf32, #tpu.memory_space<vmem>>, vector<32x1xf32>
    %cst_25 = arith.constant dense<0.000000e+00> : vector<8x1xf32>
    %29 = tpu.matmul %20, %28, %cst_25 {dimension_numbers = #tpu.dot_dimension_numbers<[1], [0], [0], [1], [0, 0, 1, 1], [], []>} : vector<8x32xf32>, vector<32x1xf32>, vector<8x1xf32> -> vector<8x1xf32>
    %c0_26 = arith.constant 0 : index
    %c0_27 = arith.constant 0 : index
    %30 = vector.load %arg11[%c0_26, %c0_27] : memref<1x1xf32, #tpu.memory_space<vmem>>, vector<1x1xf32>
    %31 = vector.broadcast %30 : vector<1x1xf32> to vector<8x1xf32>
    %32 = arith.addf %29, %31 : vector<8x1xf32>
    %c0_28 = arith.constant 0 : index
    %c0_29 = arith.constant 0 : index
    %33 = vector.load %arg12[%c0_28, %c0_29] : memref<32x1xf32, #tpu.memory_space<vmem>>, vector<32x1xf32>
    %cst_30 = arith.constant dense<0.000000e+00> : vector<8x1xf32>
    %34 = tpu.matmul %27, %33, %cst_30 {dimension_numbers = #tpu.dot_dimension_numbers<[1], [0], [0], [1], [0, 0, 1, 1], [], []>} : vector<8x32xf32>, vector<32x1xf32>, vector<8x1xf32> -> vector<8x1xf32>
    %c0_31 = arith.constant 0 : index
    %c0_32 = arith.constant 0 : index
    %35 = vector.load %arg13[%c0_31, %c0_32] : memref<1x1xf32, #tpu.memory_space<vmem>>, vector<1x1xf32>
    %36 = vector.broadcast %35 : vector<1x1xf32> to vector<8x1xf32>
    %37 = arith.addf %34, %36 : vector<8x1xf32>
    %c0_33 = arith.constant 0 : index
    %c0_34 = arith.constant 0 : index
    %38 = vector.load %arg14[%c0_33, %c0_34] : memref<8x1xf32, #tpu.memory_space<vmem>>, vector<8x1xf32>
    tpu.vector_store %arg14[%c0_33, %c0_34], %32 {strides = array<i32>} : memref<8x1xf32, #tpu.memory_space<vmem>>, vector<8x1xf32>,
    %c0_35 = arith.constant 0 : index
    %c0_36 = arith.constant 0 : index
    %39 = vector.load %arg15[%c0_35, %c0_36] : memref<8x1xf32, #tpu.memory_space<vmem>>, vector<8x1xf32>
    tpu.vector_store %arg15[%c0_35, %c0_36], %37 {strides = array<i32>} : memref<8x1xf32, #tpu.memory_space<vmem>>, vector<8x1xf32>,
    return
  }
  func.func @transform_0(%arg0: i32) -> (i32, i32) {
    %c0_i32 = arith.constant 0 : i32
    %c0_i32_0 = arith.constant 0 : i32
    return %arg0, %c0_i32 : i32, i32
  }
  func.func @transform_1(%arg0: i32) -> (i32, i32) {
    %c0_i32 = arith.constant 0 : i32
    %c0_i32_0 = arith.constant 0 : i32
    return %arg0, %c0_i32 : i32, i32
  }
  func.func @transform_2(%arg0: i32) -> (i32, i32) {
    %c0_i32 = arith.constant 0 : i32
    %c0_i32_0 = arith.constant 0 : i32
    %c0_i32_1 = arith.constant 0 : i32
    return %c0_i32, %c0_i32_0 : i32, i32
  }
  func.func @transform_3(%arg0: i32) -> (i32, i32) {
    %c0_i32 = arith.constant 0 : i32
    %c0_i32_0 = arith.constant 0 : i32
    %c0_i32_1 = arith.constant 0 : i32
    return %c0_i32, %c0_i32_0 : i32, i32
  }
  func.func @transform_4(%arg0: i32) -> (i32, i32) {
    %c0_i32 = arith.constant 0 : i32
    %c0_i32_0 = arith.constant 0 : i32
    %c0_i32_1 = arith.constant 0 : i32
    return %c0_i32, %c0_i32_0 : i32, i32
  }
  func.func @transform_5(%arg0: i32) -> (i32, i32) {
    %c0_i32 = arith.constant 0 : i32
    %c0_i32_0 = arith.constant 0 : i32
    %c0_i32_1 = arith.constant 0 : i32
    return %c0_i32, %c0_i32_0 : i32, i32
  }
  func.func @transform_6(%arg0: i32) -> (i32, i32) {
    %c0_i32 = arith.constant 0 : i32
    %c0_i32_0 = arith.constant 0 : i32
    %c0_i32_1 = arith.constant 0 : i32
    return %c0_i32, %c0_i32_0 : i32, i32
  }
  func.func @transform_7(%arg0: i32) -> (i32, i32) {
    %c0_i32 = arith.constant 0 : i32
    %c0_i32_0 = arith.constant 0 : i32
    %c0_i32_1 = arith.constant 0 : i32
    return %c0_i32, %c0_i32_0 : i32, i32
  }
  func.func @transform_8(%arg0: i32) -> (i32, i32) {
    %c0_i32 = arith.constant 0 : i32
    %c0_i32_0 = arith.constant 0 : i32
    %c0_i32_1 = arith.constant 0 : i32
    return %c0_i32, %c0_i32_0 : i32, i32
  }
  func.func @transform_9(%arg0: i32) -> (i32, i32) {
    %c0_i32 = arith.constant 0 : i32
    %c0_i32_0 = arith.constant 0 : i32
    %c0_i32_1 = arith.constant 0 : i32
    return %c0_i32, %c0_i32_0 : i32, i32
  }
  func.func @transform_10(%arg0: i32) -> (i32, i32) {
    %c0_i32 = arith.constant 0 : i32
    %c0_i32_0 = arith.constant 0 : i32
    %c0_i32_1 = arith.constant 0 : i32
    return %c0_i32, %c0_i32_0 : i32, i32
  }
  func.func @transform_11(%arg0: i32) -> (i32, i32) {
    %c0_i32 = arith.constant 0 : i32
    %c0_i32_0 = arith.constant 0 : i32
    %c0_i32_1 = arith.constant 0 : i32
    return %c0_i32, %c0_i32_0 : i32, i32
  }
  func.func @transform_12(%arg0: i32) -> (i32, i32) {
    %c0_i32 = arith.constant 0 : i32
    %c0_i32_0 = arith.constant 0 : i32
    %c0_i32_1 = arith.constant 0 : i32
    return %c0_i32, %c0_i32_0 : i32, i32
  }
  func.func @transform_13(%arg0: i32) -> (i32, i32) {
    %c0_i32 = arith.constant 0 : i32
    %c0_i32_0 = arith.constant 0 : i32
    return %arg0, %c0_i32 : i32, i32
  }
  func.func @transform_14(%arg0: i32) -> (i32, i32) {
    %c0_i32 = arith.constant 0 : i32
    %c0_i32_0 = arith.constant 0 : i32
    return %arg0, %c0_i32 : i32, i32
  }
}

</mosaic_0001>

<bundles_post_ra>
// kernel: tpu_custom_call.1
= control target key start
LH: loop header
LB: loop body
LE: loop exit
PB: predicated region body
PF: predicated region fallthrough
CT: control target
= control target key end

     0   :  { %s965_s0 = inlined_call_operand.hbm [shape: f32[8,16], index: 0, kind: input, shape index: {}]   ;;  %s966_s1 = inlined_call_operand.hbm [shape: f32[8,8], index: 1, kind: input, shape index: {}]   ;;  %s967_s2 = inlined_call_operand.hbm [shape: f32[16,64], index: 2, kind: input, shape index: {}]   ;;  %s968_s3 = inlined_call_operand.vmem [shape: f32[8,64], index: 3, kind: input, shape index: {}]   ;;  %s969_s4 = inlined_call_operand.vmem [shape: f32[1,64], index: 4, kind: input, shape index: {}]   ;;  %s970_s5 = inlined_call_operand.vmem [shape: f32[32,32], index: 5, kind: input, shape index: {}]   ;;  %s971_s6 = inlined_call_operand.vmem [shape: f32[1,32], index: 6, kind: input, shape index: {}]   ;;  %s972_s7 = inlined_call_operand.vmem [shape: f32[32,32], index: 7, kind: input, shape index: {}]   ;;  %s973_s8 = inlined_call_operand.vmem [shape: f32[1,32], index: 8, kind: input, shape index: {}]   ;;  %s974_s9 = inlined_call_operand.vmem [shape: f32[32,1], index: 9, kind: input, shape index: {}]   ;;  %s975_s10 = inlined_call_operand.<no memory space> [shape: f32[1,1], index: 10, kind: input, shape index: {}]   ;;  %s976_s11 = inlined_call_operand.vmem [shape: f32[32,1], index: 11, kind: input, shape index: {}]   ;;  %s977_s13 = inlined_call_operand.vmem [shape: f32[8,1], index: 13, kind: output, shape index: {0}]   ;;  %s978_s14 = inlined_call_operand.vmem [shape: f32[8,1], index: 14, kind: output, shape index: {1}]   ;;  %s979_s12 = inlined_call_operand.<no memory space> [shape: f32[1,1], index: 12, kind: input, shape index: {}]  }
   0x1   :  { %v20_v0 = vstv %s975_s10  ;;  %v22_v1 = vstv %s979_s12 }
   0x2   :  { %21 = vst [vmem:[#allocation2] sm:$0x1] %v20_v0  ;;  %23 = vst [vmem:[#allocation3] sm:$0x1] %v22_v1 }
   0x3   :  { %24 = vsyncpa [#allocation5], 0 }
   0x4   :  { %25 = vsyncpa [#allocation7], 0  ;;  %s766_s17 = smov [#allocation6]   ;;  %s767_s19 = smov [#allocation4]  }
   0x5   :  { %s42_s18 = sshll.u32 %s766_s17, 4  ;;  %s32_s20 = sshll.u32 %s767_s19, 4  ;;  %s43_s18 = int_to_ptr.vmem [resolvable:$true] %s42_s18  ;;  %s33_s20 = int_to_ptr.vmem [resolvable:$true] %s32_s20 }
   0x6   :  { %s710_s21 = scalar_lea.vmem %s43_s18, 128  ;;  %p715_p1 = scmp.lt.s32.totalorder %s43_s18, %s43_s18 }
   0x7   :  { %p711_p0 = scmp.ne.s32.totalorder %s43_s18, %s710_s21  ;;  %p716_p2 = scmp.lt.s32.totalorder %s710_s21, %s710_s21 }
   0x9   :  { %p717_p3 = por %p716_p2, %p715_p1 }
   0xb   :  { %p718_p4 = pnand %p717_p3, %p711_p0 }
   0xd   :  { %721 = shalt.err (!%p718_p4)
}
   0xe   :  { %45 = dma.hbm_to_vmem [thread:$0]  %s966_s1, 128, %s43_s18, [#allocation7]  }
   0xf   :  { %s730_s12 = scalar_lea.vmem %s33_s20, 128  ;;  %p735_p6 = scmp.lt.s32.totalorder %s33_s20, %s33_s20 }
  0x10   :  { %p731_p5 = scmp.ne.s32.totalorder %s33_s20, %s730_s12  ;;  %p736_p7 = scmp.lt.s32.totalorder %s730_s12, %s730_s12 }
  0x12   :  { %p737_p8 = por %p736_p7, %p735_p6 }
  0x14   :  { %p738_p9 = pnand %p737_p8, %p731_p5 }
  0x16   :  { %741 = shalt.err (!%p738_p9)
}
  0x17   :  { %35 = dma.hbm_to_vmem [thread:$0]  %s965_s0, 128, %s33_s20, [#allocation5]  }
  0x18   :  { %s768_s25 = smov [#allocation8]  }
  0x19   :  { %s51_s26 = sshll.u32 %s768_s25, 4  ;;  %s52_s26 = int_to_ptr.vmem [resolvable:$true] %s51_s26 }
  0x1a   :  { %s750_s27 = scalar_lea.vmem %s52_s26, 256  ;;  %p755_p11 = scmp.lt.s32.totalorder %s52_s26, %s52_s26 }
  0x1b   :  { %p751_p10 = scmp.ne.s32.totalorder %s52_s26, %s750_s27  ;;  %p756_p12 = scmp.lt.s32.totalorder %s750_s27, %s750_s27 }
  0x1d   :  { %p757_p13 = por %p756_p12, %p755_p11 }
  0x1f   :  { %p758_p0 = pnand %p757_p13, %p751_p10 }
  0x21   :  { %761 = shalt.err (!%p758_p0)
}
  0x22   :  { %s769_s1 = smov 128   ;;  %s770_s28 = smov 8  }
  0x23   :  { %57 = dma.hbm_to_vmem [thread:$0]  %s967_s2, 256, %s52_s26, [#allocation7], %s769_s1, %s769_s1, %s770_s28  }
  0x24   :  { %762 = dma.done.wait [#allocation5], 128  }
  0x25   :  { %763 = vsyncadd [#allocation5], 4294967168 }
  0x26   :  { %764 = dma.done.wait [#allocation7], 384  }
  0x27   :  { %765 = vsyncadd [#allocation7], 4294966912  ;;  %v771_v2 = vmov 0.0   ;;  %vm772_vm0 = vmmov 0   ;;  %vm92_vm1 = vcmask 64512   ;;  %v91_v3 = vld [vmem:[%s968_s3] sm:$0xff] }
  0x28   :  { %638 = vmatprep.subr.mxu0 %v771_v2  ;;  %643 = vmatprep.subr.mxu1 %v771_v2  ;;  %v89_v4 = vld [vmem:[#allocation8 + $0x8] sm:$0xff]  ;;  %v90_v5 = vld [vmem:[#allocation6] sm:$0xff]  ;;  %v88_v6 = vld [vmem:[#allocation8] sm:$0xff]  ;;  %vm166_vm2 = vcmask 130048   ;;  %vm260_vm3 = vcmask 261120   ;;  %vm589_vm4 = vcmask 7168  }
  0x29   :  { %640 = vmatprep.mubr.msk.f32.mxu0 %vm772_vm0, %v771_v2  ;;  %647 = vmatprep.mubr.msk.f32.mxu1 %vm772_vm0, %v771_v2  ;;  %v87_v7 = vld [vmem:[#allocation4] sm:$0xff]  ;;  %v252_v8 = vld [vmem:[%s970_s5 + $0x18] sm:$0xff]  ;;  %v251_v9 = vld [vmem:[%s970_s5 + $0x10] sm:$0xff] }
  0x2a   :  { %639 = vmatpush3.msra.mxu0 %v91_v3  ;;  %644 = vmatpush3.msra.mxu1 %v89_v4  ;;  %v250_v10 = vld [vmem:[%s970_s5 + $0x8] sm:$0xff]  ;;  %v249_v11 = vld [vmem:[%s970_s5] sm:$0xff]  ;;  %v338_v12 = vld [vmem:[%s972_s7 + $0x18] sm:$0xff] }
  0x2b   :  { %641 = vmatmul.mubr.msk.f32.vlgmr.msra.gmra.mxu0 %vm92_vm1, %v90_v5  ;;  %645 = vmatprep.subr.mxu1 %v771_v2  ;;  %v337_v13 = vld [vmem:[%s972_s7 + $0x10] sm:$0xff]  ;;  %v336_v14 = vld [vmem:[%s972_s7 + $0x8] sm:$0xff]  ;;  %v335_v15 = vld [vmem:[%s972_s7] sm:$0xff]  ;;  %s773_s7 = smov 96  }
  0x2c   :  { %646 = vmatpush3.msra.mxu1 %v88_v6  ;;  %650 = vmatprep.subr.mxu0 %v771_v2  ;;  %v604_v19 = vld [vmem:[%s969_s4] ss:$0 sm:$0xff]  ;;  %v424_v24 = vld [vmem:[%s974_s9 + $0x18] sm:$0xff]  ;;  %v423_v25 = vld [vmem:[%s974_s9 + $0x10] sm:$0xff] }
  0x2d   :  { %648 = vmatmul.mubr.msk.f32.vlgmr.msra.gmra.mxu1 %vm166_vm2, %v87_v7  ;;  %658 = vmatprep.mubr.msk.f32.mxu0 %vm772_vm0, %v771_v2  ;;  %v422_v26 = vld [vmem:[%s974_s9 + $0x8] sm:$0xff]  ;;  %v421_v27 = vld [vmem:[%s974_s9] sm:$0xff]  ;;  %v508_v28 = vld [vmem:[%s976_s11 + $0x18] sm:$0xff] }
  0x2e   :  { %661 = vmatprep.subr.mxu1 %v771_v2  ;;  %669 = vmatprep.mubr.msk.f32.mxu1 %vm772_vm0, %v771_v2  ;;  %v507_v30 = vld [vmem:[%s976_s11 + $0x10] sm:$0xff]  ;;  %v506_v31 = vld [vmem:[%s976_s11 + $0x8] sm:$0xff]  ;;  %v505_v32 = vld [vmem:[%s976_s11] sm:$0xff] }
  0x2f   :  { %651 = vmatpush3.msra.mxu0 %v252_v8  ;;  %662 = vmatpush3.msra.mxu1 %v338_v12  ;;  %v605_v33 = vld [vmem:[%s971_s6] ss:$0 sm:$0xff]  ;;  %v611_v47 = vld [vmem:[#allocation3] ss:$0 sm:$0xff] }
  0x30   :  { %652 = vmatprep.subr.mxu0 %v771_v2  ;;  %663 = vmatprep.subr.mxu1 %v771_v2  ;;  %v607_v38 = vld [vmem:[%s973_s8] ss:$0 sm:$0xff] }
  0x31   :  { %653 = vmatpush3.msra.mxu0 %v251_v9  ;;  %664 = vmatpush3.msra.mxu1 %v337_v13  ;;  %v609_v43 = vld [vmem:[#allocation2] ss:$0 sm:$0xff] }
  0x32   :  { %654 = vmatprep.subr.mxu0 %v771_v2  ;;  %665 = vmatprep.subr.mxu1 %v771_v2 }
  0x33   :  { %655 = vmatpush3.msra.mxu0 %v250_v10  ;;  %666 = vmatpush3.msra.mxu1 %v336_v14 }
  0x34   :  { %656 = vmatprep.subr.mxu0 %v771_v2  ;;  %667 = vmatprep.subr.mxu1 %v771_v2 }
  0x35   :  { %657 = vmatpush3.msra.mxu0 %v249_v11  ;;  %668 = vmatpush3.msra.mxu1 %v335_v15 }
  0x36   :  { %672 = vmatprep.subr.mxu0 %v771_v2  ;;  %683 = vmatprep.subr.mxu1 %v771_v2 }
  0xeb   :  { %v162_v16 = vpop.f32.mrf.mxu0 }
  0xed   :  { %v642_v17 = vpop.f32.mrf.mxu0  ;;  %v236_v18 = vpop.f32.mrf.mxu1 }
  0xee   :  { %v237_v20 = vadd.f32 %v236_v18, %v162_v16 }
  0xef   :  { %v649_v21 = vpop.f32.mrf.mxu1 }
  0xf0   :  { %v247_v22 = vadd.f32 %v604_v19, %v237_v20 }
  0xf2   :  { %v248_v23 = vmax.f32 %v247_v22, 0.0 }
  0xf4   :  { %659 = vmatmul.mubr.msk.f32.vlgmr.msra.gmra.mxu0 %vm260_vm3, %v248_v23  ;;  %346 = vrot.lane.b32.xlu0 %v248_v23, %s773_s7 }
  0xf5   :  { %673 = vmatpush3.msra.mxu0 %v424_v24  ;;  %680 = vmatprep.mubr.msk.f32.mxu0 %vm772_vm0, %v771_v2 }
  0xf6   :  { %674 = vmatprep.subr.mxu0 %v771_v2 }
  0xf7   :  { %675 = vmatpush3.msra.mxu0 %v423_v25 }
  0xf8   :  { %676 = vmatprep.subr.mxu0 %v771_v2 }
  0xf9   :  { %677 = vmatpush3.msra.mxu0 %v422_v26 }
  0xfa   :  { %678 = vmatprep.subr.mxu0 %v771_v2 }
  0xfb   :  { %679 = vmatpush3.msra.mxu0 %v421_v27 }
 0x166   :  { %v347_v29 = vpop.permute.xlu0 %346 }
 0x167   :  { %670 = vmatmul.mubr.msk.f32.vlgmr.msra.gmra.mxu1 %vm260_vm3, %v347_v29 }
 0x168   :  { %684 = vmatpush3.msra.mxu1 %v508_v28  ;;  %691 = vmatprep.mubr.msk.f32.mxu1 %vm772_vm0, %v771_v2 }
 0x169   :  { %685 = vmatprep.subr.mxu1 %v771_v2 }
 0x16a   :  { %686 = vmatpush3.msra.mxu1 %v507_v30 }
 0x16b   :  { %687 = vmatprep.subr.mxu1 %v771_v2 }
 0x16c   :  { %688 = vmatpush3.msra.mxu1 %v506_v31 }
 0x16d   :  { %689 = vmatprep.subr.mxu1 %v771_v2 }
 0x16e   :  { %690 = vmatpush3.msra.mxu1 %v505_v32 }
 0x1b4   :  { %v330_v34 = vpop.f32.mrf.mxu0 }
 0x1b5   :  { %v331_v35 = vadd.f32 %v605_v33, %v330_v34 }
 0x1b6   :  { %v660_v36 = vpop.f32.mrf.mxu0 }
 0x1b7   :  { %v334_v37 = vmax.f32 %v331_v35, 0.0 }
 0x1b9   :  { %681 = vmatmul.mubr.msk.f32.vlgmr.msra.gmra.mxu0 %vm260_vm3, %v334_v37 }
 0x227   :  { %v416_v39 = vpop.f32.mrf.mxu1 }
 0x228   :  { %v417_v40 = vadd.f32 %v607_v38, %v416_v39 }
 0x229   :  { %v671_v41 = vpop.f32.mrf.mxu1 }
 0x22a   :  { %v420_v42 = vmax.f32 %v417_v40, 0.0 }
 0x22c   :  { %692 = vmatmul.mubr.msk.f32.vlgmr.msra.gmra.mxu1 %vm260_vm3, %v420_v42 }
 0x279   :  { %v501_v44 = vpop.f32.mrf.mxu0 }
 0x27a   :  { %v502_v45 = vadd.f32 %v609_v43, %v501_v44 }
 0x27b   :  { %v682_v46 = vpop.f32.mrf.mxu0 }
 0x27c   :  { %590 = vst.msk [vmem:[%s977_s13] sm:$0xff] %vm589_vm4, %v502_v45 }
 0x2ec   :  { %v585_v48 = vpop.f32.mrf.mxu1 }
 0x2ed   :  { %v586_v49 = vadd.f32 %v611_v47, %v585_v48 }
 0x2ee   :  { %v693_v50 = vpop.f32.mrf.mxu1 }
 0x2ef   :  { %591 = vst.msk [vmem:[%s978_s14] sm:$0xff] %vm589_vm4, %v586_v49 }
 0x2f0   :  { %600 = vsyncpa [#allocation5], 1 }
 0x2f1   :  { %601 = vsyncpa [#allocation7], 1 }

// kernel: tpu_custom_call.1
= control target key start
LH: loop header
LB: loop body
LE: loop exit
PB: predicated region body
PF: predicated region fallthrough
CT: control target
= control target key end

     0   :  { %s965_s0 = inlined_call_operand.hbm [shape: f32[8,16], index: 0, kind: input, shape index: {}]   ;;  %s966_s1 = inlined_call_operand.hbm [shape: f32[8,8], index: 1, kind: input, shape index: {}]   ;;  %s967_s2 = inlined_call_operand.hbm [shape: f32[16,64], index: 2, kind: input, shape index: {}]   ;;  %s968_s3 = inlined_call_operand.vmem [shape: f32[8,64], index: 3, kind: input, shape index: {}]   ;;  %s969_s4 = inlined_call_operand.vmem [shape: f32[1,64], index: 4, kind: input, shape index: {}]   ;;  %s970_s5 = inlined_call_operand.vmem [shape: f32[32,32], index: 5, kind: input, shape index: {}]   ;;  %s971_s6 = inlined_call_operand.vmem [shape: f32[1,32], index: 6, kind: input, shape index: {}]   ;;  %s972_s7 = inlined_call_operand.vmem [shape: f32[32,32], index: 7, kind: input, shape index: {}]   ;;  %s973_s8 = inlined_call_operand.vmem [shape: f32[1,32], index: 8, kind: input, shape index: {}]   ;;  %s974_s9 = inlined_call_operand.vmem [shape: f32[32,1], index: 9, kind: input, shape index: {}]   ;;  %s975_s10 = inlined_call_operand.<no memory space> [shape: f32[1,1], index: 10, kind: input, shape index: {}]   ;;  %s976_s11 = inlined_call_operand.vmem [shape: f32[32,1], index: 11, kind: input, shape index: {}]   ;;  %s977_s13 = inlined_call_operand.vmem [shape: f32[8,1], index: 13, kind: output, shape index: {0}]   ;;  %s978_s14 = inlined_call_operand.vmem [shape: f32[8,1], index: 14, kind: output, shape index: {1}]   ;;  %s979_s12 = inlined_call_operand.<no memory space> [shape: f32[1,1], index: 12, kind: input, shape index: {}]  }
   0x1   :  { %v20_v0 = vstv %s975_s10  ;;  %v22_v1 = vstv %s979_s12 }
   0x2   :  { %21 = vst [vmem:[#allocation2] sm:$0x1] %v20_v0  ;;  %23 = vst [vmem:[#allocation3] sm:$0x1] %v22_v1 }
   0x3   :  { %24 = vsyncpa [#allocation5], 0 }
   0x4   :  { %25 = vsyncpa [#allocation7], 0  ;;  %s766_s17 = smov [#allocation6]   ;;  %s767_s19 = smov [#allocation4]  }
   0x5   :  { %s42_s18 = sshll.u32 %s766_s17, 4  ;;  %s32_s20 = sshll.u32 %s767_s19, 4  ;;  %s43_s18 = int_to_ptr.vmem [resolvable:$true] %s42_s18  ;;  %s33_s20 = int_to_ptr.vmem [resolvable:$true] %s32_s20 }
   0x6   :  { %s710_s21 = scalar_lea.vmem %s43_s18, 128  ;;  %p715_p1 = scmp.lt.s32.totalorder %s43_s18, %s43_s18 }
   0x7   :  { %p711_p0 = scmp.ne.s32.totalorder %s43_s18, %s710_s21  ;;  %p716_p2 = scmp.lt.s32.totalorder %s710_s21, %s710_s21 }
   0x9   :  { %p717_p3 = por %p716_p2, %p715_p1 }
   0xb   :  { %p718_p4 = pnand %p717_p3, %p711_p0 }
   0xd   :  { %721 = shalt.err (!%p718_p4)
}
   0xe   :  { %45 = dma.hbm_to_vmem [thread:$0]  %s966_s1, 128, %s43_s18, [#allocation7]  }
   0xf   :  { %s730_s12 = scalar_lea.vmem %s33_s20, 128  ;;  %p735_p6 = scmp.lt.s32.totalorder %s33_s20, %s33_s20 }
  0x10   :  { %p731_p5 = scmp.ne.s32.totalorder %s33_s20, %s730_s12  ;;  %p736_p7 = scmp.lt.s32.totalorder %s730_s12, %s730_s12 }
  0x12   :  { %p737_p8 = por %p736_p7, %p735_p6 }
  0x14   :  { %p738_p9 = pnand %p737_p8, %p731_p5 }
  0x16   :  { %741 = shalt.err (!%p738_p9)
}
  0x17   :  { %35 = dma.hbm_to_vmem [thread:$0]  %s965_s0, 128, %s33_s20, [#allocation5]  }
  0x18   :  { %s768_s25 = smov [#allocation8]  }
  0x19   :  { %s51_s26 = sshll.u32 %s768_s25, 4  ;;  %s52_s26 = int_to_ptr.vmem [resolvable:$true] %s51_s26 }
  0x1a   :  { %s750_s27 = scalar_lea.vmem %s52_s26, 256  ;;  %p755_p11 = scmp.lt.s32.totalorder %s52_s26, %s52_s26 }
  0x1b   :  { %p751_p10 = scmp.ne.s32.totalorder %s52_s26, %s750_s27  ;;  %p756_p12 = scmp.lt.s32.totalorder %s750_s27, %s750_s27 }
  0x1d   :  { %p757_p13 = por %p756_p12, %p755_p11 }
  0x1f   :  { %p758_p0 = pnand %p757_p13, %p751_p10 }
  0x21   :  { %761 = shalt.err (!%p758_p0)
}
  0x22   :  { %s769_s1 = smov 128   ;;  %s770_s28 = smov 8  }
  0x23   :  { %57 = dma.hbm_to_vmem [thread:$0]  %s967_s2, 256, %s52_s26, [#allocation7], %s769_s1, %s769_s1, %s770_s28  }
  0x24   :  { %762 = dma.done.wait [#allocation5], 128  }
  0x25   :  { %763 = vsyncadd [#allocation5], 4294967168 }
  0x26   :  { %764 = dma.done.wait [#allocation7], 384  }
  0x27   :  { %765 = vsyncadd [#allocation7], 4294966912  ;;  %v771_v2 = vmov 0.0   ;;  %vm772_vm0 = vmmov 0   ;;  %vm92_vm1 = vcmask 64512   ;;  %v91_v3 = vld [vmem:[%s968_s3] sm:$0xff] }
  0x28   :  { %638 = vmatprep.subr.mxu0 %v771_v2  ;;  %643 = vmatprep.subr.mxu1 %v771_v2  ;;  %v89_v4 = vld [vmem:[#allocation8 + $0x8] sm:$0xff]  ;;  %v90_v5 = vld [vmem:[#allocation6] sm:$0xff]  ;;  %v88_v6 = vld [vmem:[#allocation8] sm:$0xff]  ;;  %vm166_vm2 = vcmask 130048   ;;  %vm260_vm3 = vcmask 261120   ;;  %vm589_vm4 = vcmask 7168  }
  0x29   :  { %640 = vmatprep.mubr.msk.f32.mxu0 %vm772_vm0, %v771_v2  ;;  %647 = vmatprep.mubr.msk.f32.mxu1 %vm772_vm0, %v771_v2  ;;  %v87_v7 = vld [vmem:[#allocation4] sm:$0xff]  ;;  %v252_v8 = vld [vmem:[%s970_s5 + $0x18] sm:$0xff]  ;;  %v251_v9 = vld [vmem:[%s970_s5 + $0x10] sm:$0xff] }
  0x2a   :  { %639 = vmatpush3.msra.mxu0 %v91_v3  ;;  %644 = vmatpush3.msra.mxu1 %v89_v4  ;;  %v250_v10 = vld [vmem:[%s970_s5 + $0x8] sm:$0xff]  ;;  %v249_v11 = vld [vmem:[%s970_s5] sm:$0xff]  ;;  %v338_v12 = vld [vmem:[%s972_s7 + $0x18] sm:$0xff] }
  0x2b   :  { %641 = vmatmul.mubr.msk.f32.vlgmr.msra.gmra.mxu0 %vm92_vm1, %v90_v5  ;;  %645 = vmatprep.subr.mxu1 %v771_v2  ;;  %v337_v13 = vld [vmem:[%s972_s7 + $0x10] sm:$0xff]  ;;  %v336_v14 = vld [vmem:[%s972_s7 + $0x8] sm:$0xff]  ;;  %v335_v15 = vld [vmem:[%s972_s7] sm:$0xff]  ;;  %s773_s7 = smov 96  }
  0x2c   :  { %646 = vmatpush3.msra.mxu1 %v88_v6  ;;  %650 = vmatprep.subr.mxu0 %v771_v2  ;;  %v604_v19 = vld [vmem:[%s969_s4] ss:$0 sm:$0xff]  ;;  %v424_v24 = vld [vmem:[%s974_s9 + $0x18] sm:$0xff]  ;;  %v423_v25 = vld [vmem:[%s974_s9 + $0x10] sm:$0xff] }
  0x2d   :  { %648 = vmatmul.mubr.msk.f32.vlgmr.msra.gmra.mxu1 %vm166_vm2, %v87_v7  ;;  %658 = vmatprep.mubr.msk.f32.mxu0 %vm772_vm0, %v771_v2  ;;  %v422_v26 = vld [vmem:[%s974_s9 + $0x8] sm:$0xff]  ;;  %v421_v27 = vld [vmem:[%s974_s9] sm:$0xff]  ;;  %v508_v28 = vld [vmem:[%s976_s11 + $0x18] sm:$0xff] }
  0x2e   :  { %661 = vmatprep.subr.mxu1 %v771_v2  ;;  %669 = vmatprep.mubr.msk.f32.mxu1 %vm772_vm0, %v771_v2  ;;  %v507_v30 = vld [vmem:[%s976_s11 + $0x10] sm:$0xff]  ;;  %v506_v31 = vld [vmem:[%s976_s11 + $0x8] sm:$0xff]  ;;  %v505_v32 = vld [vmem:[%s976_s11] sm:$0xff] }
  0x2f   :  { %651 = vmatpush3.msra.mxu0 %v252_v8  ;;  %662 = vmatpush3.msra.mxu1 %v338_v12  ;;  %v605_v33 = vld [vmem:[%s971_s6] ss:$0 sm:$0xff]  ;;  %v611_v47 = vld [vmem:[#allocation3] ss:$0 sm:$0xff] }
  0x30   :  { %652 = vmatprep.subr.mxu0 %v771_v2  ;;  %663 = vmatprep.subr.mxu1 %v771_v2  ;;  %v607_v38 = vld [vmem:[%s973_s8] ss:$0 sm:$0xff] }
  0x31   :  { %653 = vmatpush3.msra.mxu0 %v251_v9  ;;  %664 = vmatpush3.msra.mxu1 %v337_v13  ;;  %v609_v43 = vld [vmem:[#allocation2] ss:$0 sm:$0xff] }
  0x32   :  { %654 = vmatprep.subr.mxu0 %v771_v2  ;;  %665 = vmatprep.subr.mxu1 %v771_v2 }
  0x33   :  { %655 = vmatpush3.msra.mxu0 %v250_v10  ;;  %666 = vmatpush3.msra.mxu1 %v336_v14 }
  0x34   :  { %656 = vmatprep.subr.mxu0 %v771_v2  ;;  %667 = vmatprep.subr.mxu1 %v771_v2 }
  0x35   :  { %657 = vmatpush3.msra.mxu0 %v249_v11  ;;  %668 = vmatpush3.msra.mxu1 %v335_v15 }
  0x36   :  { %672 = vmatprep.subr.mxu0 %v771_v2  ;;  %683 = vmatprep.subr.mxu1 %v771_v2 }
  0xeb   :  { %v162_v16 = vpop.f32.mrf.mxu0 }
  0xed   :  { %v642_v17 = vpop.f32.mrf.mxu0  ;;  %v236_v18 = vpop.f32.mrf.mxu1 }
  0xee   :  { %v237_v20 = vadd.f32 %v236_v18, %v162_v16 }
  0xef   :  { %v649_v21 = vpop.f32.mrf.mxu1 }
  0xf0   :  { %v247_v22 = vadd.f32 %v604_v19, %v237_v20 }
  0xf2   :  { %v248_v23 = vmax.f32 %v247_v22, 0.0 }
  0xf4   :  { %659 = vmatmul.mubr.msk.f32.vlgmr.msra.gmra.mxu0 %vm260_vm3, %v248_v23  ;;  %346 = vrot.lane.b32.xlu0 %v248_v23, %s773_s7 }
  0xf5   :  { %673 = vmatpush3.msra.mxu0 %v424_v24  ;;  %680 = vmatprep.mubr.msk.f32.mxu0 %vm772_vm0, %v771_v2 }
  0xf6   :  { %674 = vmatprep.subr.mxu0 %v771_v2 }
  0xf7   :  { %675 = vmatpush3.msra.mxu0 %v423_v25 }
  0xf8   :  { %676 = vmatprep.subr.mxu0 %v771_v2 }
  0xf9   :  { %677 = vmatpush3.msra.mxu0 %v422_v26 }
  0xfa   :  { %678 = vmatprep.subr.mxu0 %v771_v2 }
  0xfb   :  { %679 = vmatpush3.msra.mxu0 %v421_v27 }
 0x166   :  { %v347_v29 = vpop.permute.xlu0 %346 }
 0x167   :  { %670 = vmatmul.mubr.msk.f32.vlgmr.msra.gmra.mxu1 %vm260_vm3, %v347_v29 }
 0x168   :  { %684 = vmatpush3.msra.mxu1 %v508_v28  ;;  %691 = vmatprep.mubr.msk.f32.mxu1 %vm772_vm0, %v771_v2 }
 0x169   :  { %685 = vmatprep.subr.mxu1 %v771_v2 }
 0x16a   :  { %686 = vmatpush3.msra.mxu1 %v507_v30 }
 0x16b   :  { %687 = vmatprep.subr.mxu1 %v771_v2 }
 0x16c   :  { %688 = vmatpush3.msra.mxu1 %v506_v31 }
 0x16d   :  { %689 = vmatprep.subr.mxu1 %v771_v2 }
 0x16e   :  { %690 = vmatpush3.msra.mxu1 %v505_v32 }
 0x1b4   :  { %v330_v34 = vpop.f32.mrf.mxu0 }
 0x1b5   :  { %v331_v35 = vadd.f32 %v605_v33, %v330_v34 }
 0x1b6   :  { %v660_v36 = vpop.f32.mrf.mxu0 }
 0x1b7   :  { %v334_v37 = vmax.f32 %v331_v35, 0.0 }
 0x1b9   :  { %681 = vmatmul.mubr.msk.f32.vlgmr.msra.gmra.mxu0 %vm260_vm3, %v334_v37 }
 0x227   :  { %v416_v39 = vpop.f32.mrf.mxu1 }
 0x228   :  { %v417_v40 = vadd.f32 %v607_v38, %v416_v39 }
 0x229   :  { %v671_v41 = vpop.f32.mrf.mxu1 }
 0x22a   :  { %v420_v42 = vmax.f32 %v417_v40, 0.0 }
 0x22c   :  { %692 = vmatmul.mubr.msk.f32.vlgmr.msra.gmra.mxu1 %vm260_vm3, %v420_v42 }
 0x279   :  { %v501_v44 = vpop.f32.mrf.mxu0 }
 0x27a   :  { %v502_v45 = vadd.f32 %v609_v43, %v501_v44 }
 0x27b   :  { %v682_v46 = vpop.f32.mrf.mxu0 }
 0x27c   :  { %590 = vst.msk [vmem:[%s977_s13] sm:$0xff] %vm589_vm4, %v502_v45 }
 0x2ec   :  { %v585_v48 = vpop.f32.mrf.mxu1 }
 0x2ed   :  { %v586_v49 = vadd.f32 %v611_v47, %v585_v48 }
 0x2ee   :  { %v693_v50 = vpop.f32.mrf.mxu1 }
 0x2ef   :  { %591 = vst.msk [vmem:[%s978_s14] sm:$0xff] %vm589_vm4, %v586_v49 }
 0x2f0   :  { %600 = vsyncpa [#allocation5], 1 }
 0x2f1   :  { %601 = vsyncpa [#allocation7], 1 }

</bundles_post_ra>
